<compile_context>
chip_gen: v6e
topology: v6e:2x2x1
jax: 0.10.0
libtpu: 0.0.40
codegen_flags: <defaults>
</compile_context>

<pallas_src>
import jax
import jax.numpy as jnp
from jax.experimental import pallas as pl
from jax.experimental.pallas import tpu as pltpu


_H1 = 128    # first hidden width
_H2 = 64     # second hidden width
_LANE = 128  # TPU lane width; output padded to this for lane-dense stores


def _round_up(x, m):
    return (x + m - 1) // m * m


# ---------------------------------------------------------------------------
# Pallas kernel: fused concat (via split W1) + 3-layer MLP
# ---------------------------------------------------------------------------
def _mlp_kernel(loc_ref, stat_ref, rays_ref, rel_ref, time_ref,
                w1a_ref, w1b_ref, w1c_ref, w1d_ref, w1e_ref, b1_ref,
                w2_ref, b2_ref, w3_ref, b3_ref, o_ref):
    # Layer 1: concat fused as a sum of partial matmuls over the 5 streams.
    h1 = jnp.dot(loc_ref[...], w1a_ref[...], preferred_element_type=jnp.float32)
    h1 = h1 + jnp.dot(stat_ref[...], w1b_ref[...], preferred_element_type=jnp.float32)
    h1 = h1 + jnp.dot(rays_ref[...], w1c_ref[...], preferred_element_type=jnp.float32)
    h1 = h1 + jnp.dot(rel_ref[...], w1d_ref[...], preferred_element_type=jnp.float32)
    h1 = h1 + jnp.dot(time_ref[...], w1e_ref[...], preferred_element_type=jnp.float32)
    h1 = jnp.maximum(h1 + b1_ref[...], 0.0)                      # ReLU
    # Layer 2
    h2 = jnp.dot(h1, w2_ref[...], preferred_element_type=jnp.float32) + b2_ref[...]
    h2 = jnp.maximum(h2, 0.0)                                    # ReLU
    # Layer 3 (output lane-padded to 128 columns; padding columns are zero)
    o_ref[...] = (
        jnp.dot(h2, w3_ref[...], preferred_element_type=jnp.float32) + b3_ref[...]
    )


# ---------------------------------------------------------------------------
# Wrapper
# ---------------------------------------------------------------------------
def improved_dqn_forward(state_dict, params, *, block_rows=512):
    """Pallas implementation of ImprovedDQN.forward.

    state_dict: dict with 'location', 'status', 'rays', optional
      'relative_pos', 'time_features', all (B, *) float32 arrays.
    params: dict with w1 (D_in,128), b1 (1,128), w2 (128,64), b2 (1,64),
      w3 (64,D_out), b3 (1,D_out)   (weights stored as (in, out)).
    """
    location = state_dict["location"]
    status = state_dict["status"]
    rays = state_dict["rays"]
    relative_pos = state_dict.get("relative_pos", jnp.zeros_like(location))
    time_features = state_dict.get(
        "time_features", jnp.zeros((location.shape[0], 2), dtype=location.dtype))

    feats = [location, status, rays, relative_pos, time_features]
    feats = [f.astype(jnp.float32) for f in feats]
    widths = [f.shape[1] for f in feats]
    input_dim = sum(widths)
    assert params["w1"].shape[0] == input_dim, "W1 rows must match concat width"

    out_dim = params["w3"].shape[1]
    out_pad = _round_up(out_dim, _LANE)

    # Batch tiling: TB rows per grid step (multiple of 8 sublanes).
    B = location.shape[0]
    TB = min(block_rows, _round_up(B, 8))
    padded_B = _round_up(B, TB)
    if padded_B != B:
        feats = [jnp.pad(f, ((0, padded_B - B), (0, 0))) for f in feats]

    # Split W1 row-wise per input stream (fuses the torch.cat into the kernel).
    # NOTE: in a jitted training loop these slices/pads are cheap one-time
    # param prep and can be hoisted out of the step function.
    w1 = params["w1"].astype(jnp.float32)
    offs = [0]
    for w in widths:
        offs.append(offs[-1] + w)
    w1_parts = [w1[offs[i]:offs[i + 1], :] for i in range(5)]

    b1 = params["b1"].astype(jnp.float32).reshape(1, _H1)
    w2 = params["w2"].astype(jnp.float32)
    b2 = params["b2"].astype(jnp.float32).reshape(1, _H2)
    # Lane-pad the output layer so every row-tile store is a full 128-lane vst.
    w3 = jnp.pad(params["w3"].astype(jnp.float32),
                 ((0, 0), (0, out_pad - out_dim)))
    b3 = jnp.pad(params["b3"].astype(jnp.float32).reshape(1, out_dim),
                 ((0, 0), (0, out_pad - out_dim)))

    grid = (padded_B // TB,)

    def row_spec(d):
        # Activation tiles: iterate over batch blocks.
        return pl.BlockSpec((TB, d), lambda i: (i, 0))

    def resident_spec(shape):
        # Whole array as a single block; constant index_map => DMA'd once and
        # kept VMEM-resident across all batch tiles.
        return pl.BlockSpec(shape, lambda i: (0, 0))

    in_specs = (
        [row_spec(d) for d in widths]
        + [resident_spec(w.shape) for w in w1_parts]
        + [resident_spec(b1.shape), resident_spec(w2.shape),
           resident_spec(b2.shape), resident_spec(w3.shape),
           resident_spec(b3.shape)]
    )
    out_specs = pl.BlockSpec((TB, out_pad), lambda i: (i, 0))

    flops = 2 * padded_B * (input_dim * _H1 + _H1 * _H2 + _H2 * out_pad)
    bytes_accessed = 4 * (
        padded_B * (input_dim + out_pad)
        + input_dim * _H1 + _H1
        + _H1 * _H2 + _H2
        + _H2 * out_pad + out_pad)

    out = pl.pallas_call(
        _mlp_kernel,
        out_shape=jax.ShapeDtypeStruct((padded_B, out_pad), jnp.float32),
        grid_spec=pltpu.PrefetchScalarGridSpec(
            num_scalar_prefetch=0,
            grid=grid,
            in_specs=in_specs,
            out_specs=out_specs,
        ),
        compiler_params=pltpu.CompilerParams(
            dimension_semantics=("parallel",)),   # megacore on v7x, no-op elsewhere
        cost_estimate=pl.CostEstimate(
            flops=flops, transcendentals=0, bytes_accessed=bytes_accessed),
    )(*feats, *w1_parts, b1, w2, b2, w3, b3)

    # Drop batch padding and lane padding.
    return out[:B, :out_dim]


# ---------------------------------------------------------------------------
# Deterministic parameter init (xavier_uniform_ weights, zero biases)
# ---------------------------------------------------------------------------
def _xavier_uniform(key, fan_in, fan_out):
    # nn.init.xavier_uniform_: U(-a, a) with a = sqrt(6 / (fan_in + fan_out)).
    bound = jnp.sqrt(6.0 / (fan_in + fan_out))
    # Stored as (fan_in, fan_out) so the kernel can do x @ W.
    return jax.random.uniform(
        key, (fan_in, fan_out), minval=-bound, maxval=bound, dtype=jnp.float32)


def init_params(key, input_dim, output_dim):
    k1, k2, k3 = jax.random.split(key, 3)
    return {
        "w1": _xavier_uniform(k1, input_dim, _H1),
        "b1": jnp.zeros((1, _H1), jnp.float32),
        "w2": _xavier_uniform(k2, _H1, _H2),
        "b2": jnp.zeros((1, _H2), jnp.float32),
        "w3": _xavier_uniform(k3, _H2, output_dim),
        "b3": jnp.zeros((1, output_dim), jnp.float32),
    }


if __name__ == "__main__":
    key = jax.random.PRNGKey(0)
    k_loc, k_stat, k_rays, k_rel, k_time, k_params = jax.random.split(key, 6)

    batch = 8
    # Feature widths: location(2) + status(4) + rays(8) + relative_pos(2) + time(2) = 18
    location = jax.random.normal(k_loc, (batch, 2), jnp.float32)
    status = jax.random.normal(k_stat, (batch, 4), jnp.float32)
    rays = jax.random.normal(k_rays, (batch, 8), jnp.float32)
    relative_pos = jax.random.normal(k_rel, (batch, 2), jnp.float32)
    time_features = jax.random.normal(k_time, (batch, 2), jnp.float32)

    input_dim = 2 + 4 + 8 + 2 + 2
    output_dim = 6
    params = init_params(k_params, input_dim, output_dim)

    state_dict = {
        "location": location,
        "status": status,
        "rays": rays,
        "relative_pos": relative_pos,
        "time_features": time_features,
    }

    out = improved_dqn_forward(state_dict, params)
    out = jax.block_until_ready(out)

    # Cross-check against a pure-JAX reference of the same forward pass.
    combined = jnp.concatenate(
        [location, status, rays, relative_pos, time_features], axis=1)
    h1 = jnp.maximum(combined @ params["w1"] + params["b1"], 0.0)
    h2 = jnp.maximum(h1 @ params["w2"] + params["b2"], 0.0)
    ref = h2 @ params["w3"] + params["b3"]
    assert out.shape == (batch, output_dim)
    assert jnp.allclose(out, ref, atol=1e-5, rtol=1e-5)

    print("KERNEL_OK")
</pallas_src>

<mosaic_0001>
module attributes {stable_mosaic.version = 11 : i64} {
  func.func @_mlp_kernel(%arg0: i32, %arg1: memref<8x2xf32, #tpu.memory_space<vmem>>, %arg2: memref<8x4xf32, #tpu.memory_space<vmem>>, %arg3: memref<8x8xf32, #tpu.memory_space<vmem>>, %arg4: memref<8x2xf32, #tpu.memory_space<vmem>>, %arg5: memref<8x2xf32, #tpu.memory_space<vmem>>, %arg6: memref<2x128xf32, #tpu.memory_space<vmem>>, %arg7: memref<4x128xf32, #tpu.memory_space<vmem>>, %arg8: memref<8x128xf32, #tpu.memory_space<vmem>>, %arg9: memref<2x128xf32, #tpu.memory_space<vmem>>, %arg10: memref<2x128xf32, #tpu.memory_space<vmem>>, %arg11: memref<1x128xf32, #tpu.memory_space<vmem>>, %arg12: memref<128x64xf32, #tpu.memory_space<vmem>>, %arg13: memref<1x64xf32, #tpu.memory_space<vmem>>, %arg14: memref<64x128xf32, #tpu.memory_space<vmem>>, %arg15: memref<1x128xf32, #tpu.memory_space<vmem>>, %arg16: memref<8x128xf32, #tpu.memory_space<vmem>>) attributes {dimension_semantics = [#tpu.dimension_semantics<parallel>], iteration_bounds = array<i64: 1>, scalar_prefetch = 0 : i64, scratch_operands = 0 : i64, tpu.core_type = #tpu.core_type<tc>, window_params = [{transform_indices = @transform_0, window_bounds = array<i64: 8, 2>}, {transform_indices = @transform_1, window_bounds = array<i64: 8, 4>}, {transform_indices = @transform_2, window_bounds = array<i64: 8, 8>}, {transform_indices = @transform_3, window_bounds = array<i64: 8, 2>}, {transform_indices = @transform_4, window_bounds = array<i64: 8, 2>}, {pipeline_mode = #tpu.pipeline_mode<synchronous>, transform_indices = @transform_5, window_bounds = array<i64: 2, 128>}, {pipeline_mode = #tpu.pipeline_mode<synchronous>, transform_indices = @transform_6, window_bounds = array<i64: 4, 128>}, {pipeline_mode = #tpu.pipeline_mode<synchronous>, transform_indices = @transform_7, window_bounds = array<i64: 8, 128>}, {pipeline_mode = #tpu.pipeline_mode<synchronous>, transform_indices = @transform_8, window_bounds = array<i64: 2, 128>}, {pipeline_mode = #tpu.pipeline_mode<synchronous>, transform_indices = @transform_9, window_bounds = array<i64: 2, 128>}, {pipeline_mode = #tpu.pipeline_mode<synchronous>, transform_indices = @transform_10, window_bounds = array<i64: 1, 128>}, {pipeline_mode = #tpu.pipeline_mode<synchronous>, transform_indices = @transform_11, window_bounds = array<i64: 128, 64>}, {pipeline_mode = #tpu.pipeline_mode<synchronous>, transform_indices = @transform_12, window_bounds = array<i64: 1, 64>}, {pipeline_mode = #tpu.pipeline_mode<synchronous>, transform_indices = @transform_13, window_bounds = array<i64: 64, 128>}, {pipeline_mode = #tpu.pipeline_mode<synchronous>, transform_indices = @transform_14, window_bounds = array<i64: 1, 128>}, {transform_indices = @transform_15, window_bounds = array<i64: 8, 128>}]} {
    %c0 = arith.constant 0 : index
    %c0_0 = arith.constant 0 : index
    %0 = vector.load %arg1[%c0, %c0_0] : memref<8x2xf32, #tpu.memory_space<vmem>>, vector<8x2xf32>
    %c0_1 = arith.constant 0 : index
    %c0_2 = arith.constant 0 : index
    %1 = vector.load %arg6[%c0_1, %c0_2] : memref<2x128xf32, #tpu.memory_space<vmem>>, vector<2x128xf32>
    %cst = arith.constant dense<0.000000e+00> : vector<8x128xf32>
    %2 = tpu.matmul %0, %1, %cst {dimension_numbers = #tpu.dot_dimension_numbers<[1], [0], [0], [1], [0, 0, 1, 1], [], []>} : vector<8x2xf32>, vector<2x128xf32>, vector<8x128xf32> -> vector<8x128xf32>
    %c0_3 = arith.constant 0 : index
    %c0_4 = arith.constant 0 : index
    %3 = vector.load %arg2[%c0_3, %c0_4] : memref<8x4xf32, #tpu.memory_space<vmem>>, vector<8x4xf32>
    %c0_5 = arith.constant 0 : index
    %c0_6 = arith.constant 0 : index
    %4 = vector.load %arg7[%c0_5, %c0_6] : memref<4x128xf32, #tpu.memory_space<vmem>>, vector<4x128xf32>
    %cst_7 = arith.constant dense<0.000000e+00> : vector<8x128xf32>
    %5 = tpu.matmul %3, %4, %cst_7 {dimension_numbers = #tpu.dot_dimension_numbers<[1], [0], [0], [1], [0, 0, 1, 1], [], []>} : vector<8x4xf32>, vector<4x128xf32>, vector<8x128xf32> -> vector<8x128xf32>
    %6 = arith.addf %2, %5 : vector<8x128xf32>
    %c0_8 = arith.constant 0 : index
    %c0_9 = arith.constant 0 : index
    %7 = vector.load %arg3[%c0_8, %c0_9] : memref<8x8xf32, #tpu.memory_space<vmem>>, vector<8x8xf32>
    %c0_10 = arith.constant 0 : index
    %c0_11 = arith.constant 0 : index
    %8 = vector.load %arg8[%c0_10, %c0_11] : memref<8x128xf32, #tpu.memory_space<vmem>>, vector<8x128xf32>
    %cst_12 = arith.constant dense<0.000000e+00> : vector<8x128xf32>
    %9 = tpu.matmul %7, %8, %cst_12 {dimension_numbers = #tpu.dot_dimension_numbers<[1], [0], [0], [1], [0, 0, 1, 1], [], []>} : vector<8x8xf32>, vector<8x128xf32>, vector<8x128xf32> -> vector<8x128xf32>
    %10 = arith.addf %6, %9 : vector<8x128xf32>
    %c0_13 = arith.constant 0 : index
    %c0_14 = arith.constant 0 : index
    %11 = vector.load %arg4[%c0_13, %c0_14] : memref<8x2xf32, #tpu.memory_space<vmem>>, vector<8x2xf32>
    %c0_15 = arith.constant 0 : index
    %c0_16 = arith.constant 0 : index
    %12 = vector.load %arg9[%c0_15, %c0_16] : memref<2x128xf32, #tpu.memory_space<vmem>>, vector<2x128xf32>
    %cst_17 = arith.constant dense<0.000000e+00> : vector<8x128xf32>
    %13 = tpu.matmul %11, %12, %cst_17 {dimension_numbers = #tpu.dot_dimension_numbers<[1], [0], [0], [1], [0, 0, 1, 1], [], []>} : vector<8x2xf32>, vector<2x128xf32>, vector<8x128xf32> -> vector<8x128xf32>
    %14 = arith.addf %10, %13 : vector<8x128xf32>
    %c0_18 = arith.constant 0 : index
    %c0_19 = arith.constant 0 : index
    %15 = vector.load %arg5[%c0_18, %c0_19] : memref<8x2xf32, #tpu.memory_space<vmem>>, vector<8x2xf32>
    %c0_20 = arith.constant 0 : index
    %c0_21 = arith.constant 0 : index
    %16 = vector.load %arg10[%c0_20, %c0_21] : memref<2x128xf32, #tpu.memory_space<vmem>>, vector<2x128xf32>
    %cst_22 = arith.constant dense<0.000000e+00> : vector<8x128xf32>
    %17 = tpu.matmul %15, %16, %cst_22 {dimension_numbers = #tpu.dot_dimension_numbers<[1], [0], [0], [1], [0, 0, 1, 1], [], []>} : vector<8x2xf32>, vector<2x128xf32>, vector<8x128xf32> -> vector<8x128xf32>
    %18 = arith.addf %14, %17 : vector<8x128xf32>
    %c0_23 = arith.constant 0 : index
    %c0_24 = arith.constant 0 : index
    %19 = vector.load %arg11[%c0_23, %c0_24] : memref<1x128xf32, #tpu.memory_space<vmem>>, vector<1x128xf32>
    %20 = vector.broadcast %19 : vector<1x128xf32> to vector<8x128xf32>
    %21 = arith.addf %18, %20 : vector<8x128xf32>
    %cst_25 = arith.constant 0.000000e+00 : f32
    %22 = vector.broadcast %cst_25 : f32 to vector<8x128xf32>
    %23 = arith.maximumf %21, %22 : vector<8x128xf32>
    %c0_26 = arith.constant 0 : index
    %c0_27 = arith.constant 0 : index
    %24 = vector.load %arg12[%c0_26, %c0_27] : memref<128x64xf32, #tpu.memory_space<vmem>>, vector<128x64xf32>
    %cst_28 = arith.constant dense<0.000000e+00> : vector<8x64xf32>
    %25 = tpu.matmul %23, %24, %cst_28 {dimension_numbers = #tpu.dot_dimension_numbers<[1], [0], [0], [1], [0, 0, 1, 1], [], []>} : vector<8x128xf32>, vector<128x64xf32>, vector<8x64xf32> -> vector<8x64xf32>
    %c0_29 = arith.constant 0 : index
    %c0_30 = arith.constant 0 : index
    %26 = vector.load %arg13[%c0_29, %c0_30] : memref<1x64xf32, #tpu.memory_space<vmem>>, vector<1x64xf32>
    %27 = vector.broadcast %26 : vector<1x64xf32> to vector<8x64xf32>
    %28 = arith.addf %25, %27 : vector<8x64xf32>
    %cst_31 = arith.constant 0.000000e+00 : f32
    %29 = vector.broadcast %cst_31 : f32 to vector<8x64xf32>
    %30 = arith.maximumf %28, %29 : vector<8x64xf32>
    %c0_32 = arith.constant 0 : index
    %c0_33 = arith.constant 0 : index
    %31 = vector.load %arg14[%c0_32, %c0_33] : memref<64x128xf32, #tpu.memory_space<vmem>>, vector<64x128xf32>
    %cst_34 = arith.constant dense<0.000000e+00> : vector<8x128xf32>
    %32 = tpu.matmul %30, %31, %cst_34 {dimension_numbers = #tpu.dot_dimension_numbers<[1], [0], [0], [1], [0, 0, 1, 1], [], []>} : vector<8x64xf32>, vector<64x128xf32>, vector<8x128xf32> -> vector<8x128xf32>
    %c0_35 = arith.constant 0 : index
    %c0_36 = arith.constant 0 : index
    %33 = vector.load %arg15[%c0_35, %c0_36] : memref<1x128xf32, #tpu.memory_space<vmem>>, vector<1x128xf32>
    %34 = vector.broadcast %33 : vector<1x128xf32> to vector<8x128xf32>
    %35 = arith.addf %32, %34 : vector<8x128xf32>
    %c0_37 = arith.constant 0 : index
    %c0_38 = arith.constant 0 : index
    %36 = vector.load %arg16[%c0_37, %c0_38] : memref<8x128xf32, #tpu.memory_space<vmem>>, vector<8x128xf32>
    tpu.vector_store %arg16[%c0_37, %c0_38], %35 {strides = array<i32>} : memref<8x128xf32, #tpu.memory_space<vmem>>, vector<8x128xf32>,
    return
  }
  func.func @transform_0(%arg0: i32) -> (i32, i32) {
    %c0_i32 = arith.constant 0 : i32
    %c0_i32_0 = arith.constant 0 : i32
    return %arg0, %c0_i32 : i32, i32
  }
  func.func @transform_1(%arg0: i32) -> (i32, i32) {
    %c0_i32 = arith.constant 0 : i32
    %c0_i32_0 = arith.constant 0 : i32
    return %arg0, %c0_i32 : i32, i32
  }
  func.func @transform_2(%arg0: i32) -> (i32, i32) {
    %c0_i32 = arith.constant 0 : i32
    %c0_i32_0 = arith.constant 0 : i32
    return %arg0, %c0_i32 : i32, i32
  }
  func.func @transform_3(%arg0: i32) -> (i32, i32) {
    %c0_i32 = arith.constant 0 : i32
    %c0_i32_0 = arith.constant 0 : i32
    return %arg0, %c0_i32 : i32, i32
  }
  func.func @transform_4(%arg0: i32) -> (i32, i32) {
    %c0_i32 = arith.constant 0 : i32
    %c0_i32_0 = arith.constant 0 : i32
    return %arg0, %c0_i32 : i32, i32
  }
  func.func @transform_5(%arg0: i32) -> (i32, i32) {
    %c0_i32 = arith.constant 0 : i32
    %c0_i32_0 = arith.constant 0 : i32
    %c0_i32_1 = arith.constant 0 : i32
    return %c0_i32, %c0_i32_0 : i32, i32
  }
  func.func @transform_6(%arg0: i32) -> (i32, i32) {
    %c0_i32 = arith.constant 0 : i32
    %c0_i32_0 = arith.constant 0 : i32
    %c0_i32_1 = arith.constant 0 : i32
    return %c0_i32, %c0_i32_0 : i32, i32
  }
  func.func @transform_7(%arg0: i32) -> (i32, i32) {
    %c0_i32 = arith.constant 0 : i32
    %c0_i32_0 = arith.constant 0 : i32
    %c0_i32_1 = arith.constant 0 : i32
    return %c0_i32, %c0_i32_0 : i32, i32
  }
  func.func @transform_8(%arg0: i32) -> (i32, i32) {
    %c0_i32 = arith.constant 0 : i32
    %c0_i32_0 = arith.constant 0 : i32
    %c0_i32_1 = arith.constant 0 : i32
    return %c0_i32, %c0_i32_0 : i32, i32
  }
  func.func @transform_9(%arg0: i32) -> (i32, i32) {
    %c0_i32 = arith.constant 0 : i32
    %c0_i32_0 = arith.constant 0 : i32
    %c0_i32_1 = arith.constant 0 : i32
    return %c0_i32, %c0_i32_0 : i32, i32
  }
  func.func @transform_10(%arg0: i32) -> (i32, i32) {
    %c0_i32 = arith.constant 0 : i32
    %c0_i32_0 = arith.constant 0 : i32
    %c0_i32_1 = arith.constant 0 : i32
    return %c0_i32, %c0_i32_0 : i32, i32
  }
  func.func @transform_11(%arg0: i32) -> (i32, i32) {
    %c0_i32 = arith.constant 0 : i32
    %c0_i32_0 = arith.constant 0 : i32
    %c0_i32_1 = arith.constant 0 : i32
    return %c0_i32, %c0_i32_0 : i32, i32
  }
  func.func @transform_12(%arg0: i32) -> (i32, i32) {
    %c0_i32 = arith.constant 0 : i32
    %c0_i32_0 = arith.constant 0 : i32
    %c0_i32_1 = arith.constant 0 : i32
    return %c0_i32, %c0_i32_0 : i32, i32
  }
  func.func @transform_13(%arg0: i32) -> (i32, i32) {
    %c0_i32 = arith.constant 0 : i32
    %c0_i32_0 = arith.constant 0 : i32
    %c0_i32_1 = arith.constant 0 : i32
    return %c0_i32, %c0_i32_0 : i32, i32
  }
  func.func @transform_14(%arg0: i32) -> (i32, i32) {
    %c0_i32 = arith.constant 0 : i32
    %c0_i32_0 = arith.constant 0 : i32
    %c0_i32_1 = arith.constant 0 : i32
    return %c0_i32, %c0_i32_0 : i32, i32
  }
  func.func @transform_15(%arg0: i32) -> (i32, i32) {
    %c0_i32 = arith.constant 0 : i32
    %c0_i32_0 = arith.constant 0 : i32
    return %arg0, %c0_i32 : i32, i32
  }
}

</mosaic_0001>

<bundles_post_ra>
// kernel: tpu_custom_call.1
= control target key start
LH: loop header
LB: loop body
LE: loop exit
PB: predicated region body
PF: predicated region fallthrough
CT: control target
= control target key end

     0   :  { %vm59_vm0 = vcmask 1043456   ;;  %v806_v2 = vmov 0.0   ;;  %vm807_vm1 = vmmov 0   ;;  %vm55_vm2 = vcmask 31744   ;;  %s1052_s0 = inlined_call_operand.vmem [shape: f32[8,2], index: 0, kind: input, shape index: {}]   ;;  %s1053_s1 = inlined_call_operand.vmem [shape: f32[8,4], index: 1, kind: input, shape index: {}]   ;;  %s1054_s2 = inlined_call_operand.vmem [shape: f32[8,8], index: 2, kind: input, shape index: {}]   ;;  %s1055_s3 = inlined_call_operand.vmem [shape: f32[8,2], index: 3, kind: input, shape index: {}]   ;;  %s1056_s4 = inlined_call_operand.vmem [shape: f32[8,2], index: 4, kind: input, shape index: {}]   ;;  %s1057_s5 = inlined_call_operand.vmem [shape: f32[2,128], index: 5, kind: input, shape index: {}]   ;;  %s1058_s6 = inlined_call_operand.vmem [shape: f32[4,128], index: 6, kind: input, shape index: {}]   ;;  %s1059_s7 = inlined_call_operand.vmem [shape: f32[8,128], index: 7, kind: input, shape index: {}]   ;;  %s1060_s8 = inlined_call_operand.vmem [shape: f32[2,128], index: 8, kind: input, shape index: {}]   ;;  %s1061_s9 = inlined_call_operand.vmem [shape: f32[2,128], index: 9, kind: input, shape index: {}]   ;;  %s1062_s10 = inlined_call_operand.vmem [shape: f32[1,128], index: 10, kind: input, shape index: {}]   ;;  %s1063_s11 = inlined_call_operand.vmem [shape: f32[128,64], index: 11, kind: input, shape index: {}]   ;;  %s1064_s12 = inlined_call_operand.vmem [shape: f32[1,64], index: 12, kind: input, shape index: {}]   ;;  %s1065_s13 = inlined_call_operand.vmem [shape: f32[64,128], index: 13, kind: input, shape index: {}]   ;;  %s1066_s14 = inlined_call_operand.vmem [shape: f32[1,128], index: 14, kind: input, shape index: {}]   ;;  %s1067_s15 = inlined_call_operand.hbm [shape: f32[8,128], index: 15, kind: output, shape index: {}]  }
   0x1   :  { %v54_v0 = vld [vmem:[%s1058_s6] sm:$0xf]  ;;  %702 = vmatprep.subr.mxu0 %v806_v2  ;;  %704 = vmatprep.mubr.msk.f32.mxu0 %vm807_vm1, %v806_v2  ;;  %vm137_vm3 = vcmask 1041408   ;;  %vm133_vm4 = vcmask 15360   ;;  %v470_v8 = vld [vmem:[%s1063_s11 + $0x78] sm:$0xff] }
   0x2   :  { %v53_v1 = vld [vmem:[%s1053_s1] sm:$0xff]  ;;  %703 = vmatpush3.msk.msra.mxu0 %vm59_vm0, %v54_v0  ;;  %717 = vmatprep.subr.mxu1 %v806_v2 }
   0x3   :  { %v52_v3 = vld [vmem:[%s1057_s5] sm:$0x3]  ;;  %705 = vmatmul.mubr.msk.f32.vlgmr.msra.gmra.mxu0 %vm55_vm2, %v53_v1  ;;  %707 = vmatprep.subr.mxu0 %v806_v2 }
   0x4   :  { %v289_v4 = vld [vmem:[%s1060_s8] sm:$0x3]  ;;  %708 = vmatpush3.msk.msra.mxu0 %vm137_vm3, %v52_v3  ;;  %709 = vmatprep.mubr.msk.f32.mxu0 %vm807_vm1, %v806_v2 }
   0x5   :  { %v51_v5 = vld [vmem:[%s1052_s0] sm:$0xff]  ;;  %712 = vmatprep.subr.mxu0 %v806_v2  ;;  %718 = vmatpush3.msk.msra.mxu1 %vm137_vm3, %v289_v4 }
   0x6   :  { %v288_v6 = vld [vmem:[%s1055_s3] sm:$0xff]  ;;  %719 = vmatprep.mubr.msk.f32.mxu1 %vm807_vm1, %v806_v2  ;;  %727 = vmatprep.subr.mxu1 %v806_v2 }
   0x7   :  { %v212_v7 = vld [vmem:[%s1059_s7] sm:$0xff] }
   0x8   :  { %20 = vsyncpa [#allocation3], 0  ;;  %710 = vmatmul.mubr.msk.f32.vlgmr.msra.gmra.mxu0 %vm133_vm4, %v51_v5  ;;  %720 = vmatmul.mubr.msk.f32.vlgmr.msra.gmra.mxu1 %vm133_vm4, %v288_v6  ;;  %v211_v9 = vld [vmem:[%s1054_s2] sm:$0xff]  ;;  %vm213_vm5 = vcmask 64512   ;;  %v469_v10 = vld [vmem:[%s1063_s11 + $0x70] sm:$0xff]  ;;  %vm564_vm6 = vcmask 523264  }
   0x9   :  { %713 = vmatpush3.msra.mxu0 %v212_v7  ;;  %714 = vmatprep.mubr.msk.f32.mxu0 %vm807_vm1, %v806_v2  ;;  %v368_v11 = vld [vmem:[%s1061_s9] sm:$0x3]  ;;  %v468_v12 = vld [vmem:[%s1063_s11 + $0x68] sm:$0xff]  ;;  %v466_v15 = vld [vmem:[%s1063_s11 + $0x58] sm:$0xff]  ;;  %s808_s2 = smov [#allocation2]  }
   0xa   :  { %722 = vmatprep.subr.mxu0 %v806_v2  ;;  %728 = vmatpush3.msra.mxu1 %v470_v8  ;;  %v367_v13 = vld [vmem:[%s1056_s4] sm:$0xff]  ;;  %v465_v16 = vld [vmem:[%s1063_s11 + $0x50] sm:$0xff]  ;;  %v464_v17 = vld [vmem:[%s1063_s11 + $0x48] sm:$0xff]  ;;  %s645_s18 = sshll.u32 %s808_s2, 4  ;;  %s646_s18 = int_to_ptr.vmem [resolvable:$true] %s645_s18 }
   0xb   :  { %729 = vmatprep.subr.mxu1 %v806_v2  ;;  %759 = vmatprep.mubr.msk.f32.mxu1 %vm807_vm1, %v806_v2  ;;  %v467_v14 = vld [vmem:[%s1063_s11 + $0x60] sm:$0xff]  ;;  %v462_v19 = vld [vmem:[%s1063_s11 + $0x38] sm:$0xff]  ;;  %v461_v20 = vld [vmem:[%s1063_s11 + $0x30] sm:$0xff]  ;;  %p789_p1 = scmp.lt.s32.totalorder %s646_s18, %s646_s18 }
   0xc   :  { %715 = vmatmul.mubr.msk.f32.vlgmr.msra.gmra.mxu0 %vm213_vm5, %v211_v9  ;;  %730 = vmatpush3.msra.mxu1 %v469_v10  ;;  %v463_v18 = vld [vmem:[%s1063_s11 + $0x40] sm:$0xff]  ;;  %v460_v21 = vld [vmem:[%s1063_s11 + $0x28] sm:$0xff]  ;;  %v458_v23 = vld [vmem:[%s1063_s11 + $0x18] sm:$0xff] }
   0xd   :  { %723 = vmatpush3.msk.msra.mxu0 %vm137_vm3, %v368_v11  ;;  %724 = vmatprep.mubr.msk.f32.mxu0 %vm807_vm1, %v806_v2  ;;  %v459_v22 = vld [vmem:[%s1063_s11 + $0x20] sm:$0xff]  ;;  %v457_v24 = vld [vmem:[%s1063_s11 + $0x10] sm:$0xff]  ;;  %v456_v25 = vld [vmem:[%s1063_s11 + $0x8] sm:$0xff] }
   0xe   :  { %731 = vmatprep.subr.mxu1 %v806_v2  ;;  %762 = vmatprep.subr.mxu0 %v806_v2  ;;  %v455_v26 = vld [vmem:[%s1063_s11] sm:$0xff]  ;;  %v556_v27 = vld [vmem:[%s1065_s13 + $0x38] sm:$0xff]  ;;  %v555_v28 = vld [vmem:[%s1065_s13 + $0x30] sm:$0xff] }
   0xf   :  { %732 = vmatpush3.msra.mxu1 %v468_v12  ;;  %v554_v29 = vld [vmem:[%s1065_s13 + $0x28] sm:$0xff]  ;;  %v553_v30 = vld [vmem:[%s1065_s13 + $0x20] sm:$0xff]  ;;  %v552_v31 = vld [vmem:[%s1065_s13 + $0x18] sm:$0xff] }
  0x10   :  { %725 = vmatmul.mubr.msk.f32.vlgmr.msra.gmra.mxu0 %vm133_vm4, %v367_v13  ;;  %733 = vmatprep.subr.mxu1 %v806_v2  ;;  %v662_v44 = vld [vmem:[%s1062_s10] ss:$0 sm:$0xff]  ;;  %v551_v49 = vld [vmem:[%s1065_s13 + $0x10] sm:$0xff]  ;;  %v550_v50 = vld [vmem:[%s1065_s13 + $0x8] sm:$0xff] }
  0x11   :  { %734 = vmatpush3.msra.mxu1 %v467_v14  ;;  %778 = vmatprep.mubr.msk.f32.mxu0 %vm807_vm1, %v806_v2  ;;  %v549_v51 = vld [vmem:[%s1065_s13] sm:$0xff]  ;;  %s784_s13 = scalar_lea.vmem %s646_s18, 128 }
  0x12   :  { %735 = vmatprep.subr.mxu1 %v806_v2  ;;  %763 = vmatpush3.msra.mxu0 %v556_v27  ;;  %v663_v52 = vld [vmem:[%s1064_s12] ss:$0 sm:$0xff]  ;;  %p785_p0 = scmp.ne.s32.totalorder %s646_s18, %s784_s13  ;;  %p790_p2 = scmp.lt.s32.totalorder %s784_s13, %s784_s13 }
  0x13   :  { %736 = vmatpush3.msra.mxu1 %v466_v15  ;;  %764 = vmatprep.subr.mxu0 %v806_v2  ;;  %v664_v57 = vld [vmem:[%s1066_s14] ss:$0 sm:$0xff] }
  0x14   :  { %737 = vmatprep.subr.mxu1 %v806_v2  ;;  %765 = vmatpush3.msra.mxu0 %v555_v28  ;;  %p791_p3 = por %p790_p2, %p789_p1 }
  0x15   :  { %738 = vmatpush3.msra.mxu1 %v465_v16  ;;  %766 = vmatprep.subr.mxu0 %v806_v2 }
  0x16   :  { %739 = vmatprep.subr.mxu1 %v806_v2  ;;  %767 = vmatpush3.msra.mxu0 %v554_v29  ;;  %p792_p4 = pnand %p791_p3, %p785_p0 }
  0x17   :  { %740 = vmatpush3.msra.mxu1 %v464_v17  ;;  %768 = vmatprep.subr.mxu0 %v806_v2 }
  0x18   :  { %741 = vmatprep.subr.mxu1 %v806_v2  ;;  %769 = vmatpush3.msra.mxu0 %v553_v30 }
  0x19   :  { %742 = vmatpush3.msra.mxu1 %v463_v18  ;;  %770 = vmatprep.subr.mxu0 %v806_v2 }
  0x1a   :  { %743 = vmatprep.subr.mxu1 %v806_v2  ;;  %771 = vmatpush3.msra.mxu0 %v552_v31 }
  0x1b   :  { %744 = vmatpush3.msra.mxu1 %v462_v19  ;;  %772 = vmatprep.subr.mxu0 %v806_v2 }
  0x1c   :  { %745 = vmatprep.subr.mxu1 %v806_v2  ;;  %773 = vmatpush3.msra.mxu0 %v551_v49 }
  0x1d   :  { %746 = vmatpush3.msra.mxu1 %v461_v20  ;;  %774 = vmatprep.subr.mxu0 %v806_v2 }
  0x1e   :  { %747 = vmatprep.subr.mxu1 %v806_v2  ;;  %775 = vmatpush3.msra.mxu0 %v550_v50 }
  0x1f   :  { %748 = vmatpush3.msra.mxu1 %v460_v21  ;;  %776 = vmatprep.subr.mxu0 %v806_v2 }
  0x20   :  { %749 = vmatprep.subr.mxu1 %v806_v2  ;;  %777 = vmatpush3.msra.mxu0 %v549_v51 }
  0x21   :  { %750 = vmatpush3.msra.mxu1 %v459_v22 }
  0x22   :  { %751 = vmatprep.subr.mxu1 %v806_v2 }
  0x23   :  { %752 = vmatpush3.msra.mxu1 %v458_v23 }
  0x24   :  { %753 = vmatprep.subr.mxu1 %v806_v2 }
  0x25   :  { %754 = vmatpush3.msra.mxu1 %v457_v24 }
  0x26   :  { %755 = vmatprep.subr.mxu1 %v806_v2 }
  0x27   :  { %756 = vmatpush3.msra.mxu1 %v456_v25 }
  0x28   :  { %757 = vmatprep.subr.mxu1 %v806_v2 }
  0x29   :  { %758 = vmatpush3.msra.mxu1 %v455_v26 }
  0xc3   :  { %v129_v32 = vpop.f32.mrf.mxu0 }
  0xc5   :  { %v706_v33 = vpop.f32.mrf.mxu0 }
  0xc8   :  { %v207_v34 = vpop.f32.mrf.mxu0  ;;  %v362_v35 = vpop.f32.mrf.mxu1 }
  0xc9   :  { %v208_v38 = vadd.f32 %v207_v34, %v129_v32 }
  0xca   :  { %v711_v36 = vpop.f32.mrf.mxu0  ;;  %v721_v37 = vpop.f32.mrf.mxu1 }
  0xcc   :  { %v283_v39 = vpop.f32.mrf.mxu0 }
  0xcd   :  { %v287_v40 = vadd.f32 %v283_v39, %v208_v38 }
  0xce   :  { %v716_v41 = vpop.f32.mrf.mxu0 }
  0xcf   :  { %v366_v42 = vadd.f32 %v362_v35, %v287_v40 }
  0xd0   :  { %v441_v43 = vpop.f32.mrf.mxu0 }
  0xd1   :  { %v445_v45 = vadd.f32 %v441_v43, %v366_v42 }
  0xd2   :  { %v726_v46 = vpop.f32.mrf.mxu0 }
  0xd3   :  { %v453_v47 = vadd.f32 %v662_v44, %v445_v45 }
  0xd5   :  { %v454_v48 = vmax.f32 %v453_v47, 0.0 }
  0xd7   :  { %760 = vmatmul.mubr.f32.vlgmr.msra.gmra.mxu1 %v454_v48 }
 0x197   :  { %v544_v53 = vpop.f32.mrf.mxu1 }
 0x198   :  { %v545_v54 = vadd.f32 %v663_v52, %v544_v53 }
 0x199   :  { %v761_v55 = vpop.f32.mrf.mxu1 }
 0x19a   :  { %v548_v56 = vmax.f32 %v545_v54, 0.0 }
 0x19c   :  { %779 = vmatmul.mubr.msk.f32.vlgmr.msra.gmra.mxu0 %vm564_vm6, %v548_v56 }
 0x25c   :  { %v634_v58 = vpop.f32.mrf.mxu0 }
 0x25d   :  { %v635_v59 = vadd.f32 %v664_v57, %v634_v58 }
 0x25e   :  { %v780_v60 = vpop.f32.mrf.mxu0 }
 0x25f   :  { %638 = vst [vmem:[#allocation2] sm:$0xff] %v635_v59 }
 0x260   :  { %795 = shalt.err (!%p792_p4)
}
 0x261   :  { %648 = dma.vmem_to_hbm [thread:$0]  %s646_s18, 128, %s1067_s15, [#allocation3]  }
 0x262   :  { %804 = dma.done.wait [#allocation3], 128  }
 0x263   :  { %805 = vsyncadd [#allocation3], 4294967168 }
 0x264   :  { %652 = vsyncpa [#allocation3], 1 }

</bundles_post_ra>
